<compile_context>
chip_gen: v7x
topology: tpu7x:2x2x1
jax: 0.10.0
libtpu: 0.0.40
codegen_flags: <defaults>
</compile_context>

<pallas_src>
import jax
import jax.numpy as jnp
from jax.experimental import pallas as pl
from jax.experimental.pallas import tpu as pltpu

EPS = 1e-5

# Slab row layout: one vector per sublane row, lane offset 0 (no lane rotates).
ROW_G1, ROW_BE1, ROW_BQ, ROW_BK, ROW_BV, ROW_BO, ROW_G2, ROW_BE2, ROW_BF1, ROW_BF2 = range(10)
SLAB_ROWS = 16      # two full (8, 128) tiles; single DMA descriptor
SLAB_LANES = 128


def transformer_block_kernel(x_ref, mask_ref, slab_ref, w_attn_ref, w1_ref, w2_ref, o_ref):
    BS, E = x_ref.shape               # (B*S, E)
    B = mask_ref.shape[0]
    S = mask_ref.shape[2]
    FF = w1_ref.shape[1]

    x = x_ref[...]                    # (BS, E)
    mask = mask_ref[...]              # (B, 1, S)  1.0 keep / 0.0 masked (key axis)

    # ---- per-channel vectors: static sublane rows of the packed slab ----
    g1  = slab_ref[ROW_G1:ROW_G1 + 1, :E]
    be1 = slab_ref[ROW_BE1:ROW_BE1 + 1, :E]
    bq  = slab_ref[ROW_BQ:ROW_BQ + 1, :E]     # pre-scaled by 1/sqrt(d_k)
    bk  = slab_ref[ROW_BK:ROW_BK + 1, :E]
    bv  = slab_ref[ROW_BV:ROW_BV + 1, :E]
    bo  = slab_ref[ROW_BO:ROW_BO + 1, :E]
    g2  = slab_ref[ROW_G2:ROW_G2 + 1, :E]
    be2 = slab_ref[ROW_BE2:ROW_BE2 + 1, :E]
    bf1 = slab_ref[ROW_BF1:ROW_BF1 + 1, :FF]
    bf2 = slab_ref[ROW_BF2:ROW_BF2 + 1, :E]

    def layernorm(z, gamma, beta):
        mu = jnp.mean(z, axis=-1, keepdims=True)
        var = jnp.mean((z - mu) ** 2, axis=-1, keepdims=True)   # biased var, like nn.LayerNorm
        return (z - mu) * jax.lax.rsqrt(var + EPS) * gamma + beta

    # ---- norm_1 ----
    xn = layernorm(x, g1, be1)

    # ---- attention: three small (E,E) dots, weights addressed along the leading axis ----
    q = jnp.dot(xn, w_attn_ref[0], preferred_element_type=jnp.float32) + bq   # scale folded in
    k = jnp.dot(xn, w_attn_ref[1], preferred_element_type=jnp.float32) + bk
    v = jnp.dot(xn, w_attn_ref[2], preferred_element_type=jnp.float32) + bv

    q3 = q.reshape(B, S, E)
    k3 = k.reshape(B, S, E)
    v3 = v.reshape(B, S, E)

    # batched q @ k^T, contract on E (no explicit transpose)
    scores = jax.lax.dot_general(
        q3, k3, dimension_numbers=(((2,), (2,)), ((0,), (0,))),
        preferred_element_type=jnp.float32)                     # (B, Sq, Sk)

    # masked_fill(mask == 0, -1e9)
    scores = jnp.where(mask == 0.0, -1e9, scores)

    # F.softmax(weights, dim=1) == softmax over the QUERY axis — reproduced exactly
    m = jnp.max(scores, axis=1, keepdims=True)
    p = jnp.exp(scores - m)
    w = p / jnp.sum(p, axis=1, keepdims=True)

    attn = jax.lax.dot_general(
        w, v3, dimension_numbers=(((2,), (1,)), ((0,), (0,))),
        preferred_element_type=jnp.float32)                     # (B, Sq, E)
    attn_out = jnp.dot(attn.reshape(BS, E), w_attn_ref[3],
                       preferred_element_type=jnp.float32) + bo

    # ---- residual 1 (dropout_1 = identity, eval mode) ----
    x2 = x + attn_out

    # ---- norm_2 + feed-forward ----
    xn2 = layernorm(x2, g2, be2)
    h = jnp.maximum(
        jnp.dot(xn2, w1_ref[...], preferred_element_type=jnp.float32) + bf1, 0.0)
    ff = jnp.dot(h, w2_ref[...], preferred_element_type=jnp.float32) + bf2

    # ---- residual 2 (dropout_2 = identity, eval mode) ----
    o_ref[...] = (x2 + ff).astype(o_ref.dtype)


def pack_params(params):
    """One-time (init) packing of parameters into dense, DMA-friendly arrays."""
    E = params["wq"].shape[0]
    FF = params["w1"].shape[1]
    assert E <= SLAB_LANES and FF <= SLAB_LANES

    scale = float(E) ** -0.5   # fold 1/sqrt(d_k) into the Q projection (once, at init)
    w_attn = jnp.stack([params["wq"] * scale, params["wk"],
                        params["wv"], params["wo"]], axis=0).astype(jnp.float32)

    slab = jnp.zeros((SLAB_ROWS, SLAB_LANES), jnp.float32)
    rows = [
        (ROW_G1,  params["g1"]),  (ROW_BE1, params["be1"]),
        (ROW_BQ,  params["bq"] * scale), (ROW_BK, params["bk"]), (ROW_BV, params["bv"]),
        (ROW_BO,  params["bo"]),  (ROW_G2,  params["g2"]),  (ROW_BE2, params["be2"]),
        (ROW_BF1, params["bf1"]), (ROW_BF2, params["bf2"]),
    ]
    for r, vec in rows:
        vec = jnp.asarray(vec, jnp.float32).reshape(-1)
        slab = slab.at[r, :vec.shape[0]].set(vec)

    return {"w_attn": w_attn, "slab": slab,
            "w1": params["w1"].astype(jnp.float32),
            "w2": params["w2"].astype(jnp.float32)}


def transformer_block(x, mask, packed):
    """x: (B, S, E); mask: (B, S) with 1.0 = keep / 0.0 = masked key position."""
    B, S, E = x.shape
    FF = packed["w1"].shape[1]
    BS = B * S

    x2d = x.reshape(BS, E)                 # identical row-major layout; no in-kernel reshape pair
    mask3 = mask.reshape(B, 1, S)          # == mask.unsqueeze(1) in the PyTorch module

    vmem = pltpu.MemorySpace.VMEM
    flops = (2 * BS * E * E * 4            # q, k, v, out projections
             + 2 * B * S * S * E * 2       # scores + attn @ v
             + 2 * BS * E * FF * 2)        # feed-forward
    transcendentals = B * S * S + 2 * BS   # exp + rsqrt
    bytes_accessed = 4 * (2 * BS * E + B * S + SLAB_ROWS * SLAB_LANES
                          + 4 * E * E + 2 * E * FF)

    out2d = pl.pallas_call(
        transformer_block_kernel,
        out_shape=jax.ShapeDtypeStruct((BS, E), x.dtype),
        in_specs=[pl.BlockSpec(memory_space=vmem)] * 6,
        out_specs=pl.BlockSpec(memory_space=vmem),
        cost_estimate=pl.CostEstimate(flops=flops,
                                      transcendentals=transcendentals,
                                      bytes_accessed=bytes_accessed),
    )(x2d, mask3, packed["slab"], packed["w_attn"], packed["w1"], packed["w2"])
    return out2d.reshape(B, S, E)


def reference(x, mask, p):
    """Pure-JAX mirror of the PyTorch forward (eval mode)."""
    def ln(z, g, b):
        mu = jnp.mean(z, axis=-1, keepdims=True)
        var = jnp.mean((z - mu) ** 2, axis=-1, keepdims=True)
        return (z - mu) / jnp.sqrt(var + EPS) * g + b

    xn = ln(x, p["g1"], p["be1"])
    q = xn @ p["wq"] + p["bq"]
    k = xn @ p["wk"] + p["bk"]
    v = xn @ p["wv"] + p["bv"]
    w = jnp.einsum("bqe,bke->bqk", q, k) / jnp.sqrt(jnp.float32(x.shape[-1]))
    w = jnp.where(mask[:, None, :] == 0.0, -1e9, w)     # mask.unsqueeze(1): (B, 1, Sk)
    w = jax.nn.softmax(w, axis=1)                       # dim=1 == query axis
    out = jnp.einsum("bqk,bke->bqe", w, v) @ p["wo"] + p["bo"]
    x2 = x + out
    xn2 = ln(x2, p["g2"], p["be2"])
    ff = jnp.maximum(xn2 @ p["w1"] + p["bf1"], 0.0) @ p["w2"] + p["bf2"]
    return x2 + ff


if __name__ == "__main__":
    B, S, E, FF = 2, 8, 32, 64
    key = jax.random.PRNGKey(0)
    ks = jax.random.split(key, 12)

    def init(k, shape, scale=0.1):
        return (scale * jax.random.normal(k, shape)).astype(jnp.float32)

    params = {
        "g1": jnp.ones((1, E), jnp.float32), "be1": jnp.zeros((1, E), jnp.float32),
        "wq": init(ks[0], (E, E)), "bq": init(ks[1], (1, E)),
        "wk": init(ks[2], (E, E)), "bk": init(ks[3], (1, E)),
        "wv": init(ks[4], (E, E)), "bv": init(ks[5], (1, E)),
        "wo": init(ks[6], (E, E)), "bo": init(ks[7], (1, E)),
        "g2": jnp.ones((1, E), jnp.float32), "be2": jnp.zeros((1, E), jnp.float32),
        "w1": init(ks[8], (E, FF)), "bf1": init(ks[9], (1, FF)),
        "w2": init(ks[10], (FF, E)), "bf2": init(ks[11], (1, E)),
    }

    packed = pack_params(params)           # one-time packing, NOT on the per-call path

    x = jax.random.normal(jax.random.PRNGKey(1), (B, S, E), dtype=jnp.float32)
    # padding mask: batch 0 fully valid, batch 1 has last 3 positions masked out
    lengths = jnp.array([S, S - 3])
    mask = (jnp.arange(S)[None, :] < lengths[:, None]).astype(jnp.float32)   # (B, S)

    fwd = jax.jit(transformer_block)
    out = jax.block_until_ready(fwd(x, mask, packed))

    ref = reference(x, mask, params)
    assert jnp.allclose(out, ref, atol=1e-4, rtol=1e-4), "mismatch vs pure-JAX reference"

    print("KERNEL_OK")
</pallas_src>

<mosaic_0001>
module attributes {stable_mosaic.version = 11 : i64} {
  func.func @transformer_block_kernel(%arg0: memref<16x32xf32, #tpu.memory_space<vmem>>, %arg1: memref<2x1x8xf32, #tpu.memory_space<vmem>>, %arg2: memref<16x128xf32, #tpu.memory_space<vmem>>, %arg3: memref<4x32x32xf32, #tpu.memory_space<vmem>>, %arg4: memref<32x64xf32, #tpu.memory_space<vmem>>, %arg5: memref<64x32xf32, #tpu.memory_space<vmem>>, %arg6: memref<16x32xf32, #tpu.memory_space<vmem>>) attributes {dimension_semantics = [], scalar_prefetch = 0 : i64, scratch_operands = 0 : i64, tpu.core_type = #tpu.core_type<tc>} {
    %c0 = arith.constant 0 : index
    %c0_0 = arith.constant 0 : index
    %0 = vector.load %arg0[%c0, %c0_0] : memref<16x32xf32, #tpu.memory_space<vmem>>, vector<16x32xf32>
    %c0_1 = arith.constant 0 : index
    %c0_2 = arith.constant 0 : index
    %c0_3 = arith.constant 0 : index
    %1 = vector.load %arg1[%c0_1, %c0_2, %c0_3] : memref<2x1x8xf32, #tpu.memory_space<vmem>>, vector<2x1x8xf32>
    %c0_4 = arith.constant 0 : index
    %c0_5 = arith.constant 0 : index
    %2 = vector.load %arg2[%c0_4, %c0_5] : memref<16x128xf32, #tpu.memory_space<vmem>>, vector<1x32xf32>
    %c1 = arith.constant 1 : index
    %c0_6 = arith.constant 0 : index
    %3 = vector.load %arg2[%c1, %c0_6] : memref<16x128xf32, #tpu.memory_space<vmem>>, vector<1x32xf32>
    %c2 = arith.constant 2 : index
    %c0_7 = arith.constant 0 : index
    %4 = vector.load %arg2[%c2, %c0_7] : memref<16x128xf32, #tpu.memory_space<vmem>>, vector<1x32xf32>
    %c3 = arith.constant 3 : index
    %c0_8 = arith.constant 0 : index
    %5 = vector.load %arg2[%c3, %c0_8] : memref<16x128xf32, #tpu.memory_space<vmem>>, vector<1x32xf32>
    %c4 = arith.constant 4 : index
    %c0_9 = arith.constant 0 : index
    %6 = vector.load %arg2[%c4, %c0_9] : memref<16x128xf32, #tpu.memory_space<vmem>>, vector<1x32xf32>
    %c5 = arith.constant 5 : index
    %c0_10 = arith.constant 0 : index
    %7 = vector.load %arg2[%c5, %c0_10] : memref<16x128xf32, #tpu.memory_space<vmem>>, vector<1x32xf32>
    %c6 = arith.constant 6 : index
    %c0_11 = arith.constant 0 : index
    %8 = vector.load %arg2[%c6, %c0_11] : memref<16x128xf32, #tpu.memory_space<vmem>>, vector<1x32xf32>
    %c7 = arith.constant 7 : index
    %c0_12 = arith.constant 0 : index
    %9 = vector.load %arg2[%c7, %c0_12] : memref<16x128xf32, #tpu.memory_space<vmem>>, vector<1x32xf32>
    %c8 = arith.constant 8 : index
    %c0_13 = arith.constant 0 : index
    %10 = vector.load %arg2[%c8, %c0_13] : memref<16x128xf32, #tpu.memory_space<vmem>>, vector<1x64xf32>
    %c9 = arith.constant 9 : index
    %c0_14 = arith.constant 0 : index
    %11 = vector.load %arg2[%c9, %c0_14] : memref<16x128xf32, #tpu.memory_space<vmem>>, vector<1x32xf32>
    %cst = arith.constant dense<0.000000e+00> : vector<16xf32>
    %12 = vector.multi_reduction <add>, %0, %cst [1] : vector<16x32xf32> to vector<16xf32>
    %13 = vector.shape_cast %12 : vector<16xf32> to vector<16x1xf32>
    %cst_15 = arith.constant 3.200000e+01 : f32
    %14 = vector.broadcast %cst_15 : f32 to vector<16x1xf32>
    %15 = arith.divf %13, %14 : vector<16x1xf32>
    %16 = vector.broadcast %15 : vector<16x1xf32> to vector<16x32xf32>
    %17 = arith.subf %0, %16 : vector<16x32xf32>
    %18 = arith.mulf %17, %17 : vector<16x32xf32>
    %cst_16 = arith.constant dense<0.000000e+00> : vector<16xf32>
    %19 = vector.multi_reduction <add>, %18, %cst_16 [1] : vector<16x32xf32> to vector<16xf32>
    %20 = vector.shape_cast %19 : vector<16xf32> to vector<16x1xf32>
    %cst_17 = arith.constant 3.200000e+01 : f32
    %21 = vector.broadcast %cst_17 : f32 to vector<16x1xf32>
    %22 = arith.divf %20, %21 : vector<16x1xf32>
    %23 = vector.broadcast %15 : vector<16x1xf32> to vector<16x32xf32>
    %24 = arith.subf %0, %23 : vector<16x32xf32>
    %cst_18 = arith.constant 9.99999974E-6 : f32
    %25 = vector.broadcast %cst_18 : f32 to vector<16x1xf32>
    %26 = arith.addf %22, %25 : vector<16x1xf32>
    %27 = math.rsqrt %26 : vector<16x1xf32>
    %28 = vector.broadcast %27 : vector<16x1xf32> to vector<16x32xf32>
    %29 = arith.mulf %24, %28 : vector<16x32xf32>
    %30 = vector.broadcast %2 : vector<1x32xf32> to vector<16x32xf32>
    %31 = arith.mulf %29, %30 : vector<16x32xf32>
    %32 = vector.broadcast %3 : vector<1x32xf32> to vector<16x32xf32>
    %33 = arith.addf %31, %32 : vector<16x32xf32>
    %c0_19 = arith.constant 0 : index
    %c0_20 = arith.constant 0 : index
    %c0_21 = arith.constant 0 : index
    %34 = vector.load %arg3[%c0_19, %c0_20, %c0_21] : memref<4x32x32xf32, #tpu.memory_space<vmem>>, vector<1x32x32xf32>
    %35 = vector.shape_cast %34 : vector<1x32x32xf32> to vector<32x32xf32>
    %cst_22 = arith.constant dense<0.000000e+00> : vector<16x32xf32>
    %36 = tpu.matmul %33, %35, %cst_22 {dimension_numbers = #tpu.dot_dimension_numbers<[1], [0], [0], [1], [0, 0, 1, 1], [], []>} : vector<16x32xf32>, vector<32x32xf32>, vector<16x32xf32> -> vector<16x32xf32>
    %37 = vector.broadcast %4 : vector<1x32xf32> to vector<16x32xf32>
    %38 = arith.addf %36, %37 : vector<16x32xf32>
    %c1_23 = arith.constant 1 : index
    %c0_24 = arith.constant 0 : index
    %c0_25 = arith.constant 0 : index
    %39 = vector.load %arg3[%c1_23, %c0_24, %c0_25] : memref<4x32x32xf32, #tpu.memory_space<vmem>>, vector<1x32x32xf32>
    %40 = vector.shape_cast %39 : vector<1x32x32xf32> to vector<32x32xf32>
    %cst_26 = arith.constant dense<0.000000e+00> : vector<16x32xf32>
    %41 = tpu.matmul %33, %40, %cst_26 {dimension_numbers = #tpu.dot_dimension_numbers<[1], [0], [0], [1], [0, 0, 1, 1], [], []>} : vector<16x32xf32>, vector<32x32xf32>, vector<16x32xf32> -> vector<16x32xf32>
    %42 = vector.broadcast %5 : vector<1x32xf32> to vector<16x32xf32>
    %43 = arith.addf %41, %42 : vector<16x32xf32>
    %c2_27 = arith.constant 2 : index
    %c0_28 = arith.constant 0 : index
    %c0_29 = arith.constant 0 : index
    %44 = vector.load %arg3[%c2_27, %c0_28, %c0_29] : memref<4x32x32xf32, #tpu.memory_space<vmem>>, vector<1x32x32xf32>
    %45 = vector.shape_cast %44 : vector<1x32x32xf32> to vector<32x32xf32>
    %cst_30 = arith.constant dense<0.000000e+00> : vector<16x32xf32>
    %46 = tpu.matmul %33, %45, %cst_30 {dimension_numbers = #tpu.dot_dimension_numbers<[1], [0], [0], [1], [0, 0, 1, 1], [], []>} : vector<16x32xf32>, vector<32x32xf32>, vector<16x32xf32> -> vector<16x32xf32>
    %47 = vector.broadcast %6 : vector<1x32xf32> to vector<16x32xf32>
    %48 = arith.addf %46, %47 : vector<16x32xf32>
    %49 = vector.shape_cast %38 : vector<16x32xf32> to vector<2x8x32xf32>
    %50 = vector.shape_cast %43 : vector<16x32xf32> to vector<2x8x32xf32>
    %51 = vector.shape_cast %48 : vector<16x32xf32> to vector<2x8x32xf32>
    %cst_31 = arith.constant dense<0.000000e+00> : vector<2x8x8xf32>
    %52 = tpu.matmul %49, %50, %cst_31 {dimension_numbers = #tpu.dot_dimension_numbers<[2], [2], [1], [1], [0, 0, 0, 1, 1, 1], [0], [0]>} : vector<2x8x32xf32>, vector<2x8x32xf32>, vector<2x8x8xf32> -> vector<2x8x8xf32>
    %cst_32 = arith.constant 0.000000e+00 : f32
    %53 = vector.broadcast %cst_32 : f32 to vector<2x1x8xf32>
    %54 = arith.cmpf oeq, %1, %53 : vector<2x1x8xf32>
    %cst_33 = arith.constant -1.000000e+09 : f32
    %55 = vector.shape_cast %54 : vector<2x1x8xi1> to vector<2x1x8xi1>
    %56 = vector.broadcast %55 : vector<2x1x8xi1> to vector<2x8x8xi1>
    %57 = vector.broadcast %cst_33 : f32 to vector<2x8x8xf32>
    %58 = arith.select %56, %57, %52 : vector<2x8x8xi1>, vector<2x8x8xf32>
    %cst_34 = arith.constant dense<0xFF800000> : vector<2x8xf32>
    %59 = vector.multi_reduction <maximumf>, %58, %cst_34 [1] : vector<2x8x8xf32> to vector<2x8xf32>
    %60 = vector.shape_cast %59 : vector<2x8xf32> to vector<2x1x8xf32>
    %61 = vector.broadcast %60 : vector<2x1x8xf32> to vector<2x8x8xf32>
    %62 = arith.subf %58, %61 : vector<2x8x8xf32>
    %63 = math.exp %62 : vector<2x8x8xf32>
    %cst_35 = arith.constant dense<0.000000e+00> : vector<2x8xf32>
    %64 = vector.multi_reduction <add>, %63, %cst_35 [1] : vector<2x8x8xf32> to vector<2x8xf32>
    %65 = vector.shape_cast %64 : vector<2x8xf32> to vector<2x1x8xf32>
    %66 = vector.broadcast %65 : vector<2x1x8xf32> to vector<2x8x8xf32>
    %67 = arith.divf %63, %66 : vector<2x8x8xf32>
    %cst_36 = arith.constant dense<0.000000e+00> : vector<2x8x32xf32>
    %68 = tpu.matmul %67, %51, %cst_36 {dimension_numbers = #tpu.dot_dimension_numbers<[2], [1], [1], [2], [0, 0, 0, 1, 1, 2], [0], [0]>} : vector<2x8x8xf32>, vector<2x8x32xf32>, vector<2x8x32xf32> -> vector<2x8x32xf32>
    %69 = vector.shape_cast %68 : vector<2x8x32xf32> to vector<16x32xf32>
    %c3_37 = arith.constant 3 : index
    %c0_38 = arith.constant 0 : index
    %c0_39 = arith.constant 0 : index
    %70 = vector.load %arg3[%c3_37, %c0_38, %c0_39] : memref<4x32x32xf32, #tpu.memory_space<vmem>>, vector<1x32x32xf32>
    %71 = vector.shape_cast %70 : vector<1x32x32xf32> to vector<32x32xf32>
    %cst_40 = arith.constant dense<0.000000e+00> : vector<16x32xf32>
    %72 = tpu.matmul %69, %71, %cst_40 {dimension_numbers = #tpu.dot_dimension_numbers<[1], [0], [0], [1], [0, 0, 1, 1], [], []>} : vector<16x32xf32>, vector<32x32xf32>, vector<16x32xf32> -> vector<16x32xf32>
    %73 = vector.broadcast %7 : vector<1x32xf32> to vector<16x32xf32>
    %74 = arith.addf %72, %73 : vector<16x32xf32>
    %75 = arith.addf %0, %74 : vector<16x32xf32>
    %cst_41 = arith.constant dense<0.000000e+00> : vector<16xf32>
    %76 = vector.multi_reduction <add>, %75, %cst_41 [1] : vector<16x32xf32> to vector<16xf32>
    %77 = vector.shape_cast %76 : vector<16xf32> to vector<16x1xf32>
    %cst_42 = arith.constant 3.200000e+01 : f32
    %78 = vector.broadcast %cst_42 : f32 to vector<16x1xf32>
    %79 = arith.divf %77, %78 : vector<16x1xf32>
    %80 = vector.broadcast %79 : vector<16x1xf32> to vector<16x32xf32>
    %81 = arith.subf %75, %80 : vector<16x32xf32>
    %82 = arith.mulf %81, %81 : vector<16x32xf32>
    %cst_43 = arith.constant dense<0.000000e+00> : vector<16xf32>
    %83 = vector.multi_reduction <add>, %82, %cst_43 [1] : vector<16x32xf32> to vector<16xf32>
    %84 = vector.shape_cast %83 : vector<16xf32> to vector<16x1xf32>
    %cst_44 = arith.constant 3.200000e+01 : f32
    %85 = vector.broadcast %cst_44 : f32 to vector<16x1xf32>
    %86 = arith.divf %84, %85 : vector<16x1xf32>
    %87 = vector.broadcast %79 : vector<16x1xf32> to vector<16x32xf32>
    %88 = arith.subf %75, %87 : vector<16x32xf32>
    %cst_45 = arith.constant 9.99999974E-6 : f32
    %89 = vector.broadcast %cst_45 : f32 to vector<16x1xf32>
    %90 = arith.addf %86, %89 : vector<16x1xf32>
    %91 = math.rsqrt %90 : vector<16x1xf32>
    %92 = vector.broadcast %91 : vector<16x1xf32> to vector<16x32xf32>
    %93 = arith.mulf %88, %92 : vector<16x32xf32>
    %94 = vector.broadcast %8 : vector<1x32xf32> to vector<16x32xf32>
    %95 = arith.mulf %93, %94 : vector<16x32xf32>
    %96 = vector.broadcast %9 : vector<1x32xf32> to vector<16x32xf32>
    %97 = arith.addf %95, %96 : vector<16x32xf32>
    %c0_46 = arith.constant 0 : index
    %c0_47 = arith.constant 0 : index
    %98 = vector.load %arg4[%c0_46, %c0_47] : memref<32x64xf32, #tpu.memory_space<vmem>>, vector<32x64xf32>
    %cst_48 = arith.constant dense<0.000000e+00> : vector<16x64xf32>
    %99 = tpu.matmul %97, %98, %cst_48 {dimension_numbers = #tpu.dot_dimension_numbers<[1], [0], [0], [1], [0, 0, 1, 1], [], []>} : vector<16x32xf32>, vector<32x64xf32>, vector<16x64xf32> -> vector<16x64xf32>
    %100 = vector.broadcast %10 : vector<1x64xf32> to vector<16x64xf32>
    %101 = arith.addf %99, %100 : vector<16x64xf32>
    %cst_49 = arith.constant 0.000000e+00 : f32
    %102 = vector.broadcast %cst_49 : f32 to vector<16x64xf32>
    %103 = arith.maximumf %101, %102 : vector<16x64xf32>
    %c0_50 = arith.constant 0 : index
    %c0_51 = arith.constant 0 : index
    %104 = vector.load %arg5[%c0_50, %c0_51] : memref<64x32xf32, #tpu.memory_space<vmem>>, vector<64x32xf32>
    %cst_52 = arith.constant dense<0.000000e+00> : vector<16x32xf32>
    %105 = tpu.matmul %103, %104, %cst_52 {dimension_numbers = #tpu.dot_dimension_numbers<[1], [0], [0], [1], [0, 0, 1, 1], [], []>} : vector<16x64xf32>, vector<64x32xf32>, vector<16x32xf32> -> vector<16x32xf32>
    %106 = vector.broadcast %11 : vector<1x32xf32> to vector<16x32xf32>
    %107 = arith.addf %105, %106 : vector<16x32xf32>
    %108 = arith.addf %75, %107 : vector<16x32xf32>
    %c0_53 = arith.constant 0 : index
    %c0_54 = arith.constant 0 : index
    %109 = vector.load %arg6[%c0_53, %c0_54] : memref<16x32xf32, #tpu.memory_space<vmem>>, vector<16x32xf32>
    tpu.vector_store %arg6[%c0_53, %c0_54], %108 {strides = array<i32>} : memref<16x32xf32, #tpu.memory_space<vmem>>, vector<16x32xf32>,
    return
  }
}

</mosaic_0001>

<bundles_post_ra>
// kernel: transformer_block.1
= control target key start
LH: loop header
LB: loop body
LE: loop exit
PB: predicated region body
PF: predicated region fallthrough
CT: control target
= control target key end

     0   :  { %11 = vsyncpa [#allocation3], 0  ;;  %s1543_s0 = inlined_call_operand.vmem [shape: f32[16,32], index: 0, kind: input, shape index: {}]   ;;  %s1544_s1 = inlined_call_operand.vmem [shape: f32[2,1,8], index: 1, kind: input, shape index: {}]   ;;  %s1545_s2 = inlined_call_operand.vmem [shape: f32[16,128], index: 2, kind: input, shape index: {}]   ;;  %s1546_s3 = inlined_call_operand.hbm [shape: f32[4,32,32], index: 3, kind: input, shape index: {}]   ;;  %s1547_s4 = inlined_call_operand.vmem [shape: f32[32,64], index: 4, kind: input, shape index: {}]   ;;  %s1548_s5 = inlined_call_operand.vmem [shape: f32[64,32], index: 5, kind: input, shape index: {}]   ;;  %s1549_s6 = inlined_call_operand.hbm [shape: f32[16,32], index: 6, kind: output, shape index: {}]  }
   0x1   :  { %12 = vsyncpa [#allocation4], 0  ;;  %s1335_s21 = smov [#allocation2]   ;;  %s1287_s25 = scalar_lea.hbm %s1546_s3, 2048 }
   0x2   :  { %s24_s22 = sshll.u32 %s1335_s21, 4  ;;  %p1288_p0 = scmp.ne.s32.totalorder %s1546_s3, %s1287_s25  ;;  %s25_s22 = int_to_ptr.vmem [resolvable:$true] %s24_s22 }
   0x3   :  { %p1291_p1 = scmp.lt.u32.totalorder %s1287_s25, %s1546_s3 }
   0x5   :  { %p1293_p2 = pnand %p1291_p1, %p1288_p0 }
   0x7   :  { %1296 = shalt.err (!%p1293_p2)
}
   0x8   :  { %s1297_s30 = scalar_lea.vmem %s25_s22, 2048  ;;  %p1302_p4 = scmp.lt.s32.totalorder %s25_s22, %s25_s22 }
   0x9   :  { %p1298_p3 = scmp.ne.s32.totalorder %s25_s22, %s1297_s30  ;;  %p1303_p5 = scmp.lt.s32.totalorder %s1297_s30, %s1297_s30 }
   0xb   :  { %p1304_p6 = por %p1303_p5, %p1302_p4 }
   0xd   :  { %p1305_p7 = pnand %p1304_p6, %p1298_p3 }
   0xf   :  { %1308 = shalt.err (!%p1305_p7)
}
  0x10   :  { %s1336_s7 = smov 128   ;;  %s1337_s8 = smov 8  }
  0x11   :  { %30 = dma.hbm_to_vmem [thread:$0]  %s1546_s3, 2048, %s25_s22, [#allocation3], %s1336_s7, %s1336_s7, %s1337_s8  }
  0x12   :  { %1331 = dma.done.wait [#allocation3], 2048  }
  0x13   :  { %1332 = vsyncadd [#allocation3], 4294965248  ;;  %vm52_vm0 = vcmask 261120   ;;  %v1395_v0 = vld [vmem:[%s1543_s0] sm:$0xff]  ;;  %v1400_v1 = vld [vmem:[%s1543_s0 + $0x8] sm:$0xff]  ;;  %v1338_v48 = vmov 0.0  }
  0x14   :  { %v53_v2 = vsel %vm52_vm0, %v1395_v0, 0.0  ;;  %v56_v3 = vsel %vm52_vm0, %v1400_v1, 0.0  ;;  %v92_v14 = vld [vmem:[#allocation2] sm:$0xff]  ;;  %v93_v15 = vld [vmem:[#allocation2 + $0x8] sm:$0xff]  ;;  %v94_v19 = vld [vmem:[#allocation2 + $0x10] sm:$0xff]  ;;  %vm1339_vm1 = vmmov 0  }
  0x15   :  { %54 = vadd.xlane.f32.xlu0 %v53_v2  ;;  %v266_v16 = vld [vmem:[#allocation2 + $0x40] sm:$0xff]  ;;  %v1208_v17 = vpack.c.bf16 %v93_v15, %v92_v14  ;;  %v267_v18 = vld [vmem:[#allocation2 + $0x48] sm:$0xff]  ;;  %v95_v20 = vld [vmem:[#allocation2 + $0x18] sm:$0xff]  ;;  %vm517_vm5 = vcmask 64512   ;;  %vm935_vm7 = vcmask 523264  }
  0x16   :  { %v1224_v21 = vpack.c.bf16 %v267_v18, %v266_v16  ;;  %v1212_v22 = vpack.c.bf16 %v95_v20, %v94_v19  ;;  %v268_v23 = vld [vmem:[#allocation2 + $0x50] sm:$0xff]  ;;  %v269_v24 = vld [vmem:[#allocation2 + $0x58] sm:$0xff]  ;;  %v182_v26 = vld [vmem:[#allocation2 + $0x20] sm:$0xff] }
  0x17   :  { %1209 = vmatprep.subr.bf16.mxu1 %v1208_v17  ;;  %v1228_v25 = vpack.c.bf16 %v269_v24, %v268_v23  ;;  %v183_v27 = vld [vmem:[#allocation2 + $0x28] sm:$0xff]  ;;  %v1038_v36 = vld [vmem:[%s1545_s2] ss:$0 sm:$0xff]  ;;  %v1039_v38 = vld [vmem:[%s1545_s2 + $0x1] ss:$0 sm:$0xff] }
  0x18   :  { %1211 = vmatpush3.bf16.msra.mxu1 %v1208_v17  ;;  %1225 = vmatprep.subr.bf16.mxu0 %v1224_v21  ;;  %v1216_v28 = vpack.c.bf16 %v183_v27, %v182_v26  ;;  %v184_v43 = vld [vmem:[#allocation2 + $0x30] sm:$0xff]  ;;  %v185_v44 = vld [vmem:[#allocation2 + $0x38] sm:$0xff]  ;;  %v1046_v49 = vld [vmem:[%s1545_s2 + $0x4] ss:$0 sm:$0xff] }
  0x19   :  { %57 = vadd.xlane.f32.xlu0 %v56_v3  ;;  %1227 = vmatpush3.bf16.msra.mxu0 %v1224_v21  ;;  %v1220_v47 = vpack.c.bf16 %v185_v44, %v184_v43  ;;  %v1043_v55 = vld [vmem:[%s1545_s2 + $0x3] ss:$0 sm:$0xff]  ;;  %v1040_v58 = vld [vmem:[%s1545_s2 + $0x2] ss:$0 sm:$0xff]  ;;  %v704_v3 = vld [vmem:[#allocation2 + $0x68] sm:$0xff] }
  0x1a   :  { %1213 = vmatprep.subr.bf16.mxu1 %v1212_v22  ;;  %1229 = vmatprep.subr.bf16.mxu0 %v1228_v25  ;;  %v703_v2 = vld [vmem:[#allocation2 + $0x60] sm:$0xff] }
  0x1c   :  { %1215 = vmatpush3.bf16.msra.mxu1 %v1212_v22 }
  0x1d   :  { %1231 = vmatpush3.bf16.msra.mxu0 %v1228_v25  ;;  %1217 = vmatprep.subr.bf16.mxu1 %v1216_v28 }
  0x1e   :  { %1157 = vmatprep.subr.mxu0 %v1338_v48 }
  0xa2   :  { %v55_v4 = vpop.xlane.xlu0 %54 }
  0xa3   :  { %v60_v5 = vmul.f32 0.03125, %v55_v4  ;;  %v1439_v4 = vpack.c.bf16 %v704_v3, %v703_v2 }
  0xa5   :  { %v62_v6 = vsub.f32 %v1395_v0, %v60_v5  ;;  %v505_v5 = vlaneseq }
  0xa6   :  { %v58_v7 = vpop.xlane.xlu0 %57 }
  0xa7   :  { %v61_v8 = vmul.f32 0.03125, %v58_v7  ;;  %v64_v9 = vmul.f32 %v62_v6, %v62_v6  ;;  %v506_v7 = vshrl.u32 %v505_v5, 7 }
  0xa9   :  { %v63_v10 = vsub.f32 %v1400_v1, %v61_v8  ;;  %v66_v11 = vsel %vm52_vm0, %v64_v9, 0.0  ;;  %v41_v8 = vld [vmem:[%s1544_s1 + $0x1] sm:$0x1]  ;;  %v507_v9 = vsub.s32 0, %v506_v7 }
  0xaa   :  { %67 = vadd.xlane.f32.xlu1 %v66_v11  ;;  %vm502_vm3 = vcmp.eq.f32.partialorder %v41_v8, 0.0 }
  0xab   :  { %v65_v12 = vmul.f32 %v63_v10, %v63_v10 }
  0xad   :  { %v69_v13 = vsel %vm52_vm0, %v65_v12, 0.0 }
  0xae   :  { %70 = vadd.xlane.f32.xlu1 %v69_v13 }
 0x137   :  { %v68_v29 = vpop.xlane.xlu1 %67 }
 0x138   :  { %v72_v30 = vmul.f32 0.03125, %v68_v29 }
 0x13a   :  { %v74_v31 = vadd.f32 1e-05, %v72_v30 }
 0x13b   :  { %v71_v32 = vpop.xlane.xlu1 %70 }
 0x13c   :  { %1271 = vrsqrt.f32 %v74_v31  ;;  %v73_v33 = vmul.f32 0.03125, %v71_v32 }
 0x13e   :  { %v75_v34 = vadd.f32 1e-05, %v73_v33 }
 0x140   :  { %1273 = vrsqrt.f32 %v75_v34 }
 0x146   :  { %v1272_v35 = vpop.eup %1271 }
 0x147   :  { %v78_v37 = vmul.f32 %v1272_v35, %v62_v6  ;;  %v40_v6 = vld [vmem:[%s1544_s1] sm:$0x1] }
 0x148   :  { %vm501_vm2 = vcmp.eq.f32.partialorder %v40_v6, 0.0 }
 0x149   :  { %v84_v39 = vmul.f32 %v1038_v36, %v78_v37 }
 0x14a   :  { %v1274_v40 = vpop.eup %1273 }
 0x14b   :  { %v79_v41 = vmul.f32 %v1274_v40, %v63_v10  ;;  %v90_v42 = vadd.f32 %v1039_v38, %v84_v39  ;;  %v1340_v10 = vmov 0  }
 0x14c   :  { %v503_v11 = vsel %vm501_vm2, 1, %v1340_v10  ;;  %v504_v13 = vsel %vm502_vm3, 1, %v1340_v10 }
 0x14d   :  { %v85_v45 = vmul.f32 %v1038_v36, %v79_v41  ;;  %1122 = vmatprep.mubr.msk.f32.mxu1 %vm52_vm0, %v90_v42  ;;  %1144 = vmatprep.mubr.msk.f32.mxu0 %vm52_vm0, %v90_v42  ;;  %v508_v12 = vrot.slane %v503_v11, %v507_v9  ;;  %v512_v14 = vrot.slane %v504_v13, %v507_v9 }
 0x14f   :  { %v91_v46 = vadd.f32 %v1039_v38, %v85_v45  ;;  %vm513_vm4 = vcmp.eq.s32.totalorder %v508_v12, 1  ;;  %vm514_vm6 = vcmp.eq.s32.totalorder %v512_v14, 1 }
 0x151   :  { %1123 = vmatmul.mubr.msk.f32.vlgmr.msra.gmra.mrb[0].mxu1 %vm52_vm0, %v91_v46  ;;  %1145 = vmatmul.mubr.msk.f32.vlgmr.msra.gmra.mrb[0].mxu0 %vm52_vm0, %v91_v46 }
 0x152   :  { %1219 = vmatpush3.bf16.msra.mxu1 %v1216_v28  ;;  %1133 = vmatprep.mubr.msk.f32.mxu1 %vm52_vm0, %v90_v42 }
 0x153   :  { %1221 = vmatprep.subr.bf16.mxu1 %v1220_v47  ;;  %1159 = vmatprep.mubr.msk.f32.mxu0 %vm1339_vm1, %v1338_v48 }
 0x156   :  { %1223 = vmatpush3.bf16.msra.mxu1 %v1220_v47 }
 0x157   :  { %1147 = vmatprep.subr.mxu1 %v1338_v48 }
 0x159   :  { %1134 = vmatmul.mubr.msk.f32.vlgmr.msra.gmra.mrb[2].mxu1 %vm52_vm0, %v91_v46 }
 0x15a   :  { %1149 = vmatprep.mubr.msk.f32.mxu1 %vm1339_vm1, %v1338_v48 }
 0x224   :  { %v1124_v50 = vpop.f32.mrb[0].mxu1  ;;  %v1146_v51 = vpop.f32.mrb[0].mxu0 }
 0x225   :  { %v172_v52 = vpop.f32.mrb[1].mxu1  ;;  %v340_v53 = vpop.f32.mrb[1].mxu0  ;;  %v178_v62 = vadd.f32 %v1124_v50, %v1040_v58  ;;  %v346_v63 = vadd.f32 %v1146_v51, %v1046_v49 }
 0x226   :  { %v341_v54 = vadd.f32 %v1046_v49, %v340_v53  ;;  %v173_v60 = vadd.f32 %v1040_v58, %v172_v52 }
 0x228   :  { %1158 = vmatpush3.msra.mxu0 %v341_v54 }
 0x229   :  { %1233 = vmatprep.subr.bf16.mxu0 %v1439_v4 }
 0x22c   :  { %v1135_v56 = vpop.f32.mrb[2].mxu1 }
 0x22d   :  { %v256_v57 = vpop.f32.mrb[3].mxu1  ;;  %v262_v61 = vadd.f32 %v1135_v56, %v1043_v55 }
 0x22e   :  { %v257_v59 = vadd.f32 %v1043_v55, %v256_v57 }
 0x230   :  { %1148 = vmatpush3.xpose.msk.msra.mxu1 %vm52_vm0, %v257_v59  ;;  %v705_v59 = vld [vmem:[#allocation2 + $0x70] sm:$0xff] }
 0x231   :  { %1152 = vmatprep.subr.mxu1 %v1338_v48 }
 0x233   :  { %1150 = vmatmul.mubr.msk.f32.vlgmr.msra.gmra.mrb[4].mxu1 %vm52_vm0, %v173_v60  ;;  %v706_v60 = vld [vmem:[#allocation2 + $0x78] sm:$0xff] }
 0x234   :  { %1153 = vmatpush3.xpose.msk.msra.mxu1 %vm52_vm0, %v262_v61  ;;  %1154 = vmatprep.mubr.msk.f32.mxu1 %vm1339_vm1, %v1338_v48  ;;  %v1236_v61 = vpack.c.bf16 %v706_v60, %v705_v59 }
 0x235   :  { %1162 = vmatprep.subr.mxu1 %v1338_v48 }
 0x237   :  { %1155 = vmatmul.mubr.msk.f32.vlgmr.msra.gmra.mrb[6].mxu1 %vm52_vm0, %v178_v62 }
 0x238   :  { %1163 = vmatpush3.msra.mxu1 %v346_v63  ;;  %1164 = vmatprep.mubr.msk.f32.mxu1 %vm1339_vm1, %v1338_v48 }
 0x306   :  { %v421_v15 = vpop.f32.mrb[4].mxu1 }
 0x307   :  { %v515_v16 = vsel %vm513_vm4, -1e+09, %v421_v15  ;;  %v1151_v17 = vpop.f32.mrb[5].mxu1 }
 0x308   :  { %v518_v18 = vsel %vm517_vm5, %v515_v16, -inf }
 0x309   :  { %v519_v19 = vrot.slane %v518_v18, 4 }
 0x30a   :  { %v497_v20 = vpop.f32.mrb[6].mxu1 }
 0x30b   :  { %v520_v21 = vmax.f32 %v518_v18, %v519_v19  ;;  %v516_v22 = vsel %vm514_vm6, -1e+09, %v497_v20  ;;  %v1156_v23 = vpop.f32.mrb[7].mxu1 }
 0x30c   :  { %v525_v24 = vsel %vm517_vm5, %v516_v22, -inf }
 0x30d   :  { %v521_v25 = vrot.slane %v520_v21, 2  ;;  %v526_v26 = vrot.slane %v525_v24, 4 }
 0x30f   :  { %v522_v27 = vmax.f32 %v520_v21, %v521_v25  ;;  %v527_v28 = vmax.f32 %v525_v24, %v526_v26  ;;  %v832_v21 = vld [vmem:[%s1547_s4] sm:$0xff]  ;;  %v834_v24 = vld [vmem:[%s1547_s4 + $0x10] sm:$0xff]  ;;  %v835_v25 = vld [vmem:[%s1547_s4 + $0x18] sm:$0xff] }
 0x310   :  { %v1244_v26 = vpack.c.bf16 %v835_v25, %v834_v24 }
 0x311   :  { %v523_v29 = vrot.slane %v522_v27, 1  ;;  %v528_v30 = vrot.slane %v527_v28, 2 }
 0x313   :  { %v524_v31 = vmax.f32 %v522_v27, %v523_v29  ;;  %v529_v32 = vmax.f32 %v527_v28, %v528_v30  ;;  %v923_v27 = vld [vmem:[%s1548_s5] sm:$0xff]  ;;  %v924_v28 = vld [vmem:[%s1548_s5 + $0x8] sm:$0xff]  ;;  %v925_v29 = vld [vmem:[%s1548_s5 + $0x10] sm:$0xff] }
 0x314   :  { %v1248_v30 = vpack.c.bf16 %v924_v28, %v923_v27 }
 0x315   :  { %v532_v33 = vsub.f32 %v515_v16, %v524_v31  ;;  %v530_v34 = vrot.slane %v529_v32, 1  ;;  %v926_v31 = vld [vmem:[%s1548_s5 + $0x18] sm:$0xff] }
 0x317   :  { %v534_v35 = vmul.f32 1.442695, %v532_v33  ;;  %v531_v36 = vmax.f32 %v529_v32, %v530_v34  ;;  %v1252_v32 = vpack.c.bf16 %v926_v31, %v925_v29  ;;  %v927_v33 = vld [vmem:[%s1548_s5 + $0x20] sm:$0xff]  ;;  %v928_v34 = vld [vmem:[%s1548_s5 + $0x28] sm:$0xff] }
 0x319   :  { %1275 = vpow2.f32 %v534_v35  ;;  %v533_v37 = vsub.f32 %v516_v22, %v531_v36  ;;  %v833_v22 = vld [vmem:[%s1547_s4 + $0x8] sm:$0xff]  ;;  %v1256_v35 = vpack.c.bf16 %v928_v34, %v927_v33 }
 0x31a   :  { %v1240_v23 = vpack.c.bf16 %v833_v22, %v832_v21 }
 0x31b   :  { %v536_v38 = vmul.f32 1.442695, %v533_v37 }
 0x31c   :  { %1241 = vmatprep.subr.bf16.mxu1 %v1240_v23 }
 0x31d   :  { %1277 = vpow2.f32 %v536_v38 }
 0x323   :  { %v1276_v39 = vpop.eup %1275 }
 0x324   :  { %v538_v40 = vsel %vm517_vm5, %v1276_v39, 0.0 }
 0x325   :  { %v539_v41 = vrot.slane %v538_v40, 4 }
 0x327   :  { %v1278_v42 = vpop.eup %1277  ;;  %v540_v43 = vadd.f32 %v539_v41, %v538_v40 }
 0x328   :  { %v545_v44 = vsel %vm517_vm5, %v1278_v42, 0.0 }
 0x329   :  { %v541_v45 = vrot.slane %v540_v43, 2  ;;  %v546_v46 = vrot.slane %v545_v44, 4 }
 0x32b   :  { %v542_v47 = vadd.f32 %v541_v45, %v540_v43  ;;  %v547_v48 = vadd.f32 %v546_v46, %v545_v44  ;;  %v1058_v43 = vld [vmem:[%s1545_s2 + $0x6] ss:$0 sm:$0xff] }
 0x32d   :  { %v543_v49 = vrot.slane %v542_v47, 1  ;;  %v548_v50 = vrot.slane %v547_v48, 2 }
 0x32f   :  { %v544_v51 = vadd.f32 %v543_v49, %v542_v47  ;;  %v549_v52 = vadd.f32 %v548_v50, %v547_v48  ;;  %v1059_v47 = vld [vmem:[%s1545_s2 + $0x7] ss:$0 sm:$0xff] }
 0x331   :  { %1279 = vrcp.f32 %v544_v51  ;;  %v550_v53 = vrot.slane %v549_v52, 1 }
 0x333   :  { %v551_v54 = vadd.f32 %v550_v53, %v549_v52  ;;  %v929_v52 = vld [vmem:[%s1548_s5 + $0x30] sm:$0xff]  ;;  %v930_v53 = vld [vmem:[%s1548_s5 + $0x38] sm:$0xff]  ;;  %s1341_s5 = smov [#allocation5]  }
 0x334   :  { %s1026_s12 = sshll.u32 %s1341_s5, 4  ;;  %s1027_s12 = int_to_ptr.vmem [resolvable:$true] %s1026_s12 }
 0x335   :  { %1281 = vrcp.f32 %v551_v54  ;;  %v1260_v54 = vpack.c.bf16 %v930_v53, %v929_v52  ;;  %s1309_s13 = scalar_lea.vmem %s1027_s12, 256  ;;  %p1314_p9 = scmp.lt.s32.totalorder %s1027_s12, %s1027_s12 }
 0x336   :  { %p1310_p8 = scmp.ne.s32.totalorder %s1027_s12, %s1309_s13  ;;  %p1315_p10 = scmp.lt.s32.totalorder %s1309_s13, %s1309_s13 }
 0x338   :  { %p1316_p11 = por %p1315_p10, %p1314_p9 }
 0x33a   :  { %p1317_p12 = pnand %p1316_p11, %p1310_p8 }
 0x33b   :  { %v1280_v55 = vpop.eup %1279 }
 0x33c   :  { %v553_v56 = vmul.f32 %v1280_v55, %v1276_v39  ;;  %v1060_v55 = vld [vmem:[%s1545_s2 + $0x8] ss:$0 sm:$0xff] }
 0x33e   :  { %1160 = vmatmul.mubr.msk.f32.vlgmr.msra.gmra.mrb[2].mxu0 %vm517_vm5, %v553_v56 }
 0x33f   :  { %v1282_v57 = vpop.eup %1281  ;;  %1235 = vmatpush3.bf16.msra.mxu0 %v1439_v4  ;;  %v1055_v4 = vld [vmem:[%s1545_s2 + $0x5] ss:$0 sm:$0xff] }
 0x340   :  { %v555_v58 = vmul.f32 %v1282_v57, %v1278_v42  ;;  %1237 = vmatprep.subr.bf16.mxu0 %v1236_v61 }
 0x342   :  { %1165 = vmatmul.mubr.msk.f32.vlgmr.msra.gmra.mrb[8].mxu1 %vm517_vm5, %v555_v58 }
 0x343   :  { %1239 = vmatpush3.bf16.msra.mxu0 %v1236_v61  ;;  %1243 = vmatpush3.bf16.msra.mxu1 %v1240_v23 }
 0x344   :  { %1245 = vmatprep.subr.bf16.mxu1 %v1244_v26  ;;  %1249 = vmatprep.subr.bf16.mxu0 %v1248_v30 }
 0x347   :  { %1247 = vmatpush3.bf16.msra.mxu1 %v1244_v26 }
 0x411   :  { %v625_v62 = vpop.f32.mrb[2].mxu0 }
 0x412   :  { %v1161_v63 = vpop.f32.mrb[3].mxu0  ;;  %1175 = vmatprep.mubr.msk.f32.mxu0 %vm52_vm0, %v625_v62  ;;  %v1063_v62 = vld [vmem:[%s1545_s2 + $0x9] ss:$0 sm:$0xff] }
 0x415   :  { %v698_v2 = vpop.f32.mrb[8].mxu1 }
 0x416   :  { %v1166_v3 = vpop.f32.mrb[9].mxu1  ;;  %1176 = vmatmul.mubr.msk.f32.vlgmr.msra.gmra.mrb[4].mxu0 %vm52_vm0, %v698_v2 }
 0x417   :  { %1251 = vmatpush3.bf16.msra.mxu0 %v1248_v30 }
 0x418   :  { %1253 = vmatprep.subr.bf16.mxu0 %v1252_v32 }
 0x41b   :  { %1255 = vmatpush3.bf16.msra.mxu0 %v1252_v32 }
 0x41c   :  { %1257 = vmatprep.subr.bf16.mxu0 %v1256_v35 }
 0x41f   :  { %1259 = vmatpush3.bf16.msra.mxu0 %v1256_v35 }
 0x420   :  { %1261 = vmatprep.subr.bf16.mxu0 %v1260_v54 }
 0x423   :  { %1263 = vmatpush3.bf16.msra.mxu0 %v1260_v54 }
 0x4e9   :  { %v1177_v5 = vpop.f32.mrb[4].mxu0 }
 0x4ea   :  { %v789_v6 = vadd.f32 %v1177_v5, %v1055_v4  ;;  %v783_v7 = vpop.f32.mrb[5].mxu0 }
 0x4eb   :  { %v784_v8 = vadd.f32 %v1055_v4, %v783_v7 }
 0x4ec   :  { %v1461_v9 = vadd.f32 %v789_v6, %v1400_v1 }
 0x4ed   :  { %v1464_v10 = vadd.f32 %v784_v8, %v1395_v0 }
 0x4ee   :  { %v797_v11 = vsel %vm52_vm0, %v1461_v9, 0.0 }
 0x4ef   :  { %798 = vadd.xlane.f32.xlu1 %v797_v11  ;;  %v794_v12 = vsel %vm52_vm0, %v1464_v10, 0.0 }
 0x4f0   :  { %795 = vadd.xlane.f32.xlu0 %v794_v12 }
 0x57c   :  { %v799_v13 = vpop.xlane.xlu1 %798 }
 0x57d   :  { %v801_v14 = vmul.f32 0.03125, %v799_v13  ;;  %v796_v15 = vpop.xlane.xlu0 %795 }
 0x57e   :  { %v800_v16 = vmul.f32 0.03125, %v796_v15 }
 0x57f   :  { %v803_v17 = vsub.f32 %v1461_v9, %v801_v14 }
 0x580   :  { %v802_v1 = vsub.f32 %v1464_v10, %v800_v16 }
 0x581   :  { %v805_v18 = vmul.f32 %v803_v17, %v803_v17 }
 0x582   :  { %v804_v19 = vmul.f32 %v802_v1, %v802_v1 }
 0x583   :  { %v809_v0 = vsel %vm52_vm0, %v805_v18, 0.0 }
 0x584   :  { %810 = vadd.xlane.f32.xlu1 %v809_v0  ;;  %v806_v20 = vsel %vm52_vm0, %v804_v19, 0.0 }
 0x585   :  { %807 = vadd.xlane.f32.xlu0 %v806_v20 }
 0x611   :  { %v811_v36 = vpop.xlane.xlu1 %810 }
 0x612   :  { %v813_v37 = vmul.f32 0.03125, %v811_v36  ;;  %v808_v38 = vpop.xlane.xlu0 %807 }
 0x613   :  { %v812_v39 = vmul.f32 0.03125, %v808_v38 }
 0x614   :  { %v815_v40 = vadd.f32 1e-05, %v813_v37 }
 0x615   :  { %v814_v41 = vadd.f32 1e-05, %v812_v39 }
 0x616   :  { %1283 = vrsqrt.f32 %v815_v40 }
 0x617   :  { %1285 = vrsqrt.f32 %v814_v41 }
 0x620   :  { %v1284_v42 = vpop.eup %1283 }
 0x621   :  { %v1286_v44 = vpop.eup %1285  ;;  %v819_v45 = vmul.f32 %v1284_v42, %v803_v17 }
 0x622   :  { %v818_v46 = vmul.f32 %v1286_v44, %v802_v1 }
 0x623   :  { %v825_v48 = vmul.f32 %v1058_v43, %v819_v45 }
 0x624   :  { %v824_v49 = vmul.f32 %v1058_v43, %v818_v46 }
 0x625   :  { %v831_v51 = vadd.f32 %v1059_v47, %v825_v48 }
 0x626   :  { %v830_v50 = vadd.f32 %v1059_v47, %v824_v49 }
 0x628   :  { %1186 = vmatprep.mubr.msk.f32.mxu1 %vm52_vm0, %v830_v50 }
 0x629   :  { %1187 = vmatmul.mubr.msk.f32.vlgmr.msra.gmra.mrb[10].mxu1 %vm52_vm0, %v831_v51 }
 0x6fc   :  { %v1188_v56 = vpop.f32.mrb[10].mxu1 }
 0x6fd   :  { %v918_v57 = vadd.f32 %v1188_v56, %v1060_v55  ;;  %v912_v58 = vpop.f32.mrb[11].mxu1 }
 0x6fe   :  { %v913_v59 = vadd.f32 %v1060_v55, %v912_v58 }
 0x6ff   :  { %v922_v61 = vmax.f32 %v918_v57, 0.0 }
 0x700   :  { %v921_v60 = vmax.f32 %v913_v59, 0.0 }
 0x702   :  { %1205 = vmatprep.mubr.msk.f32.mxu0 %vm935_vm7, %v921_v60 }
 0x703   :  { %1206 = vmatmul.mubr.msk.f32.vlgmr.msra.gmra.mrb[6].mxu0 %vm935_vm7, %v922_v61 }
 0x7d6   :  { %v1207_v63 = vpop.f32.mrb[6].mxu0 }
 0x7d7   :  { %v1014_v2 = vadd.f32 %v1207_v63, %v1063_v62  ;;  %v1008_v3 = vpop.f32.mrb[7].mxu0 }
 0x7d8   :  { %v1009_v4 = vadd.f32 %v1063_v62, %v1008_v3 }
 0x7d9   :  { %v1018_v5 = vadd.f32 %v1014_v2, %v1461_v9 }
 0x7da   :  { %v1017_v6 = vadd.f32 %v1009_v4, %v1464_v10 }
 0x7db   :  { %1020 = vst.msk [vmem:[#allocation5 + $0x8] sm:$0xff] %vm52_vm0, %v1018_v5 }
 0x7dc   :  { %1019 = vst.msk [vmem:[#allocation5] sm:$0xff] %vm52_vm0, %v1017_v6 }
 0x7dd   :  { %1320 = shalt.err (!%p1317_p12)
}
 0x7de   :  { %s1321_s0 = scalar_lea.hbm %s1549_s6, 256 }
 0x7df   :  { %p1322_p13 = scmp.ne.s32.totalorder %s1549_s6, %s1321_s0  ;;  %p1325_p0 = scmp.lt.u32.totalorder %s1321_s0, %s1549_s6 }
 0x7e1   :  { %p1327_p1 = pnand %p1325_p0, %p1322_p13 }
 0x7e3   :  { %1330 = shalt.err (!%p1327_p1)
}
 0x7e4   :  { %1032 = dma.vmem_to_hbm [thread:$0]  %s1027_s12, 256, %s1549_s6, [#allocation4], %s1336_s7, %s1336_s7, %s1337_s8  }
 0x7e5   :  { %1333 = dma.done.wait [#allocation4], 256  }
 0x7e6   :  { %1334 = vsyncadd [#allocation4], 4294967040 }
 0x7e7   :  { %1036 = vsyncpa [#allocation3], 1 }
 0x7e8   :  { %1037 = vsyncpa [#allocation4], 1 }

</bundles_post_ra>
